<compile_context>
chip_gen: v6e
topology: v6e:2x2x1
jax: 0.10.0
libtpu: 0.0.40
codegen_flags: <defaults>
</compile_context>

<pallas_src>
import functools
import math

import jax
import jax.numpy as jnp
from jax.experimental import pallas as pl
from jax.experimental.pallas import tpu as pltpu

EPS = 1e-6  # LayerNorm eps, matches the PyTorch module
_VMEM_LIMIT_BYTES = 48 * 1024 * 1024  # below v7x's 64 MiB physical VMEM


def _layer_norm(x, a, b):
    # Matches PyTorch: a_2 * (x - mean) / (std + eps) + b_2, where std is the
    # *unbiased* std (torch.Tensor.std default, divides by D-1), added to eps
    # (NOT sqrt(var + eps)).  Kept in f32.
    mean = jnp.mean(x, axis=-1, keepdims=True)
    diff = x - mean
    var = jnp.sum(diff * diff, axis=-1, keepdims=True) / (x.shape[-1] - 1)
    std = jnp.sqrt(var)
    return a * diff / (std + EPS) + b


def encoder_layer_kernel(x_ref, mask_ref,
                         ln1_a, ln1_b,
                         wqkv, bqkv, wo, bo,
                         ln2_a, ln2_b,
                         w1, b1, w2, b2,
                         fn_a, fn_b,
                         o_ref, *, num_heads, apply_final_norm):
    x = x_ref[0]            # (S, D) f32
    mask = mask_ref[0]      # (1, S) f32, broadcasts over heads & query positions
    S, D = x.shape
    H = num_heads
    dk = D // H
    scale = 1.0 / math.sqrt(dk)

    # Additive mask bias computed ONCE (f32), broadcast over (H, S_q, S_k).
    bias = jnp.where(mask == 0.0, -1e9, 0.0)[None]          # (1, 1, S)

    # ---- sublayer 1: x + self_attn(norm(x))   (dropout == identity, eval) ----
    xn = _layer_norm(x, ln1_a[...], ln1_b[...])
    # Fused QKV projection: one (S, D) @ (D, 3D) bf16 matmul, f32 accumulation.
    qkv = jnp.dot(xn.astype(jnp.bfloat16), wqkv[...],
                  preferred_element_type=jnp.float32) + bqkv[...]   # (S, 3D) f32

    def split_heads(block2d):                                # (S, D) -> (H, S, dk)
        return jnp.stack([block2d[:, h * dk:(h + 1) * dk] for h in range(H)],
                         axis=0)

    q = split_heads(qkv[:, 0 * D:1 * D] * scale).astype(jnp.bfloat16)
    k = split_heads(qkv[:, 1 * D:2 * D]).astype(jnp.bfloat16)
    v = split_heads(qkv[:, 2 * D:3 * D]).astype(jnp.bfloat16)

    # Batched (over heads) attention; scores/softmax in f32.
    scores = jnp.einsum('hqd,hkd->hqk', q, k,
                        preferred_element_type=jnp.float32)          # (H, S, S)
    scores = scores + bias
    scores = scores - jnp.max(scores, axis=-1, keepdims=True)
    p = jnp.exp(scores)
    p = p * pl.reciprocal(jnp.sum(p, axis=-1, keepdims=True), approx=True)
    ctx = jnp.einsum('hqk,hkd->hqd', p.astype(jnp.bfloat16), v,
                     preferred_element_type=jnp.float32)             # (H, S, dk)
    ctx = jnp.concatenate([ctx[h] for h in range(H)], axis=-1)       # (S, D)

    # Single output projection on the concatenated heads.
    attn = jnp.dot(ctx.astype(jnp.bfloat16), wo[...],
                   preferred_element_type=jnp.float32) + bo[...]
    x = x + attn
    # TODO(synk): dropout in SublayerConnection / FFN treated as identity (eval mode).

    # ---- sublayer 2: x + ffn(norm(x)) ----
    xn2 = _layer_norm(x, ln2_a[...], ln2_b[...])
    h1 = jnp.maximum(
        jnp.dot(xn2.astype(jnp.bfloat16), w1[...],
                preferred_element_type=jnp.float32) + b1[...], 0.0)
    ff = jnp.dot(h1.astype(jnp.bfloat16), w2[...],
                 preferred_element_type=jnp.float32) + b2[...]
    x = x + ff

    # ---- Encoder's final LayerNorm fused into the last layer's kernel ----
    if apply_final_norm:
        x = _layer_norm(x, fn_a[...], fn_b[...])
    o_ref[0] = x


def _full_spec(shape):
    nd = len(shape)
    return pl.BlockSpec(shape, lambda b, _nd=nd: (0,) * _nd)


def encoder_layer_call(x, mask, lp, norm_a, norm_b, num_heads, apply_final_norm):
    B, S, D = x.shape
    weights = [lp["ln1_a"], lp["ln1_b"],
               lp["wqkv"], lp["bqkv"], lp["wo"], lp["bo"],
               lp["ln2_a"], lp["ln2_b"],
               lp["w1"], lp["b1"], lp["w2"], lp["b2"],
               norm_a, norm_b]
    in_specs = [pl.BlockSpec((1, S, D), lambda b: (b, 0, 0)),
                pl.BlockSpec((1, 1, S), lambda b: (b, 0, 0))]
    in_specs += [_full_spec(w.shape) for w in weights]
    kernel = functools.partial(encoder_layer_kernel, num_heads=num_heads,
                               apply_final_norm=apply_final_norm)
    return pl.pallas_call(
        kernel,
        out_shape=jax.ShapeDtypeStruct((B, S, D), jnp.float32),
        grid=(B,),
        in_specs=in_specs,
        out_specs=pl.BlockSpec((1, S, D), lambda b: (b, 0, 0)),
        compiler_params=pltpu.CompilerParams(
            dimension_semantics=("parallel",),
            vmem_limit_bytes=_VMEM_LIMIT_BYTES),
    )(x, mask, *weights)


def encoder_forward(x, mask, params, num_heads):
    layers = params["layers"]
    assert len(layers) >= 1
    n = len(layers)
    for i, lp in enumerate(layers):
        x = encoder_layer_call(x, mask, lp, params["norm_a"], params["norm_b"],
                               num_heads, apply_final_norm=(i == n - 1))
    return x


def init_params(key, n_layers, d_model, d_ff):
    # Deterministic synthetic init (Linear weights stored as (in, out); y = x @ W + b).
    # Matmul weights are stored in bf16 (f32 accumulation inside the kernel);
    # LayerNorm params and biases stay f32.
    def normal(k, shape, scale=0.1):
        return jax.random.normal(k, shape, jnp.float32) * scale

    layers = []
    for _ in range(n_layers):
        key, k0, k1, k2, k3, k4, k5 = jax.random.split(key, 7)
        wq = normal(k0, (d_model, d_model))
        wk = normal(k1, (d_model, d_model))
        wv = normal(k2, (d_model, d_model))
        layers.append(dict(
            ln1_a=jnp.ones((1, d_model), jnp.float32),
            ln1_b=jnp.zeros((1, d_model), jnp.float32),
            wqkv=jnp.concatenate([wq, wk, wv], axis=1).astype(jnp.bfloat16),
            bqkv=jnp.zeros((1, 3 * d_model), jnp.float32),
            wo=normal(k3, (d_model, d_model)).astype(jnp.bfloat16),
            bo=jnp.zeros((1, d_model), jnp.float32),
            ln2_a=jnp.ones((1, d_model), jnp.float32),
            ln2_b=jnp.zeros((1, d_model), jnp.float32),
            w1=normal(k4, (d_model, d_ff)).astype(jnp.bfloat16),
            b1=jnp.zeros((1, d_ff), jnp.float32),
            w2=normal(k5, (d_ff, d_model)).astype(jnp.bfloat16),
            b2=jnp.zeros((1, d_model), jnp.float32),
        ))
    return dict(layers=layers,
                norm_a=jnp.ones((1, d_model), jnp.float32),
                norm_b=jnp.zeros((1, d_model), jnp.float32))


if __name__ == "__main__":
    B, S, D, H, DFF, N = 2, 8, 32, 4, 64, 2
    key = jax.random.PRNGKey(0)
    kx, kp = jax.random.split(key)

    x = jax.random.normal(kx, (B, S, D), jnp.float32)
    mask = jnp.ones((B, 1, S), jnp.float32).at[:, :, -2:].set(0.0)  # mask last 2 positions
    params = init_params(kp, N, D, DFF)

    out = encoder_forward(x, mask, params, H)
    out = jax.block_until_ready(out)
    assert out.shape == (B, S, D) and bool(jnp.all(jnp.isfinite(out)))
    print("KERNEL_OK")
</pallas_src>

<mosaic_0001>
module attributes {stable_mosaic.version = 11 : i64} {
  func.func @encoder_layer_kernel(%arg0: i32, %arg1: memref<1x8x32xf32, #tpu.memory_space<vmem>>, %arg2: memref<1x1x8xf32, #tpu.memory_space<vmem>>, %arg3: memref<1x32xf32, #tpu.memory_space<vmem>>, %arg4: memref<1x32xf32, #tpu.memory_space<vmem>>, %arg5: memref<32x96xbf16, #tpu.memory_space<vmem>>, %arg6: memref<1x96xf32, #tpu.memory_space<vmem>>, %arg7: memref<32x32xbf16, #tpu.memory_space<vmem>>, %arg8: memref<1x32xf32, #tpu.memory_space<vmem>>, %arg9: memref<1x32xf32, #tpu.memory_space<vmem>>, %arg10: memref<1x32xf32, #tpu.memory_space<vmem>>, %arg11: memref<32x64xbf16, #tpu.memory_space<vmem>>, %arg12: memref<1x64xf32, #tpu.memory_space<vmem>>, %arg13: memref<64x32xbf16, #tpu.memory_space<vmem>>, %arg14: memref<1x32xf32, #tpu.memory_space<vmem>>, %arg15: memref<1x32xf32, #tpu.memory_space<vmem>>, %arg16: memref<1x32xf32, #tpu.memory_space<vmem>>, %arg17: memref<1x8x32xf32, #tpu.memory_space<vmem>>) attributes {dimension_semantics = [#tpu.dimension_semantics<parallel>], iteration_bounds = array<i64: 2>, scalar_prefetch = 0 : i64, scratch_operands = 0 : i64, tpu.core_type = #tpu.core_type<tc>, window_params = [{transform_indices = @transform_0, window_bounds = array<i64: 1, 8, 32>}, {transform_indices = @transform_1, window_bounds = array<i64: 1, 1, 8>}, {pipeline_mode = #tpu.pipeline_mode<synchronous>, transform_indices = @transform_2, window_bounds = array<i64: 1, 32>}, {pipeline_mode = #tpu.pipeline_mode<synchronous>, transform_indices = @transform_3, window_bounds = array<i64: 1, 32>}, {pipeline_mode = #tpu.pipeline_mode<synchronous>, transform_indices = @transform_4, window_bounds = array<i64: 32, 96>}, {pipeline_mode = #tpu.pipeline_mode<synchronous>, transform_indices = @transform_5, window_bounds = array<i64: 1, 96>}, {pipeline_mode = #tpu.pipeline_mode<synchronous>, transform_indices = @transform_6, window_bounds = array<i64: 32, 32>}, {pipeline_mode = #tpu.pipeline_mode<synchronous>, transform_indices = @transform_7, window_bounds = array<i64: 1, 32>}, {pipeline_mode = #tpu.pipeline_mode<synchronous>, transform_indices = @transform_8, window_bounds = array<i64: 1, 32>}, {pipeline_mode = #tpu.pipeline_mode<synchronous>, transform_indices = @transform_9, window_bounds = array<i64: 1, 32>}, {pipeline_mode = #tpu.pipeline_mode<synchronous>, transform_indices = @transform_10, window_bounds = array<i64: 32, 64>}, {pipeline_mode = #tpu.pipeline_mode<synchronous>, transform_indices = @transform_11, window_bounds = array<i64: 1, 64>}, {pipeline_mode = #tpu.pipeline_mode<synchronous>, transform_indices = @transform_12, window_bounds = array<i64: 64, 32>}, {pipeline_mode = #tpu.pipeline_mode<synchronous>, transform_indices = @transform_13, window_bounds = array<i64: 1, 32>}, {pipeline_mode = #tpu.pipeline_mode<synchronous>, transform_indices = @transform_14, window_bounds = array<i64: 1, 32>}, {pipeline_mode = #tpu.pipeline_mode<synchronous>, transform_indices = @transform_15, window_bounds = array<i64: 1, 32>}, {transform_indices = @transform_16, window_bounds = array<i64: 1, 8, 32>}]} {
    %c0 = arith.constant 0 : index
    %c0_0 = arith.constant 0 : index
    %c0_1 = arith.constant 0 : index
    %0 = vector.load %arg1[%c0, %c0_0, %c0_1] : memref<1x8x32xf32, #tpu.memory_space<vmem>>, vector<1x8x32xf32>
    %1 = vector.shape_cast %0 : vector<1x8x32xf32> to vector<8x32xf32>
    %c0_2 = arith.constant 0 : index
    %c0_3 = arith.constant 0 : index
    %c0_4 = arith.constant 0 : index
    %2 = vector.load %arg2[%c0_2, %c0_3, %c0_4] : memref<1x1x8xf32, #tpu.memory_space<vmem>>, vector<1x1x8xf32>
    %3 = vector.shape_cast %2 : vector<1x1x8xf32> to vector<1x8xf32>
    %cst = arith.constant 0.000000e+00 : f32
    %4 = vector.broadcast %cst : f32 to vector<1x8xf32>
    %5 = arith.cmpf oeq, %3, %4 : vector<1x8xf32>
    %cst_5 = arith.constant -1.000000e+09 : f32
    %cst_6 = arith.constant 0.000000e+00 : f32
    %6 = vector.broadcast %cst_5 : f32 to vector<1x8xf32>
    %7 = vector.broadcast %cst_6 : f32 to vector<1x8xf32>
    %8 = arith.select %5, %6, %7 : vector<1x8xi1>, vector<1x8xf32>
    %9 = vector.shape_cast %8 : vector<1x8xf32> to vector<1x1x8xf32>
    %c0_7 = arith.constant 0 : index
    %c0_8 = arith.constant 0 : index
    %10 = vector.load %arg3[%c0_7, %c0_8] : memref<1x32xf32, #tpu.memory_space<vmem>>, vector<1x32xf32>
    %c0_9 = arith.constant 0 : index
    %c0_10 = arith.constant 0 : index
    %11 = vector.load %arg4[%c0_9, %c0_10] : memref<1x32xf32, #tpu.memory_space<vmem>>, vector<1x32xf32>
    %cst_11 = arith.constant dense<0.000000e+00> : vector<8xf32>
    %12 = vector.multi_reduction <add>, %1, %cst_11 [1] : vector<8x32xf32> to vector<8xf32>
    %13 = vector.shape_cast %12 : vector<8xf32> to vector<8x1xf32>
    %cst_12 = arith.constant 3.200000e+01 : f32
    %14 = vector.broadcast %cst_12 : f32 to vector<8x1xf32>
    %15 = arith.divf %13, %14 : vector<8x1xf32>
    %16 = vector.broadcast %15 : vector<8x1xf32> to vector<8x32xf32>
    %17 = arith.subf %1, %16 : vector<8x32xf32>
    %18 = arith.mulf %17, %17 : vector<8x32xf32>
    %cst_13 = arith.constant dense<0.000000e+00> : vector<8xf32>
    %19 = vector.multi_reduction <add>, %18, %cst_13 [1] : vector<8x32xf32> to vector<8xf32>
    %20 = vector.shape_cast %19 : vector<8xf32> to vector<8x1xf32>
    %cst_14 = arith.constant 3.100000e+01 : f32
    %21 = vector.broadcast %cst_14 : f32 to vector<8x1xf32>
    %22 = arith.divf %20, %21 : vector<8x1xf32>
    %23 = math.sqrt %22 : vector<8x1xf32>
    %24 = vector.broadcast %10 : vector<1x32xf32> to vector<8x32xf32>
    %25 = arith.mulf %24, %17 : vector<8x32xf32>
    %cst_15 = arith.constant 9.99999997E-7 : f32
    %26 = vector.broadcast %cst_15 : f32 to vector<8x1xf32>
    %27 = arith.addf %23, %26 : vector<8x1xf32>
    %28 = vector.broadcast %27 : vector<8x1xf32> to vector<8x32xf32>
    %29 = arith.divf %25, %28 : vector<8x32xf32>
    %30 = vector.broadcast %11 : vector<1x32xf32> to vector<8x32xf32>
    %31 = arith.addf %29, %30 : vector<8x32xf32>
    %32 = arith.truncf %31 : vector<8x32xf32> to vector<8x32xbf16>
    %c0_16 = arith.constant 0 : index
    %c0_17 = arith.constant 0 : index
    %33 = vector.load %arg5[%c0_16, %c0_17] : memref<32x96xbf16, #tpu.memory_space<vmem>>, vector<32x96xbf16>
    %cst_18 = arith.constant dense<0.000000e+00> : vector<8x96xf32>
    %34 = tpu.matmul %32, %33, %cst_18 {dimension_numbers = #tpu.dot_dimension_numbers<[1], [0], [0], [1], [0, 0, 1, 1], [], []>} : vector<8x32xbf16>, vector<32x96xbf16>, vector<8x96xf32> -> vector<8x96xf32>
    %c0_19 = arith.constant 0 : index
    %c0_20 = arith.constant 0 : index
    %35 = vector.load %arg6[%c0_19, %c0_20] : memref<1x96xf32, #tpu.memory_space<vmem>>, vector<1x96xf32>
    %36 = vector.broadcast %35 : vector<1x96xf32> to vector<8x96xf32>
    %37 = arith.addf %34, %36 : vector<8x96xf32>
    %38 = vector.extract_strided_slice %37 {offsets = [0, 0], sizes = [8, 32], strides = [1, 1]} : vector<8x96xf32> to vector<8x32xf32>
    %cst_21 = arith.constant 0.353553385 : f32
    %39 = vector.broadcast %cst_21 : f32 to vector<8x32xf32>
    %40 = arith.mulf %38, %39 : vector<8x32xf32>
    %41 = vector.extract_strided_slice %40 {offsets = [0, 0], sizes = [8, 8], strides = [1, 1]} : vector<8x32xf32> to vector<8x8xf32>
    %42 = vector.extract_strided_slice %40 {offsets = [0, 8], sizes = [8, 8], strides = [1, 1]} : vector<8x32xf32> to vector<8x8xf32>
    %43 = vector.extract_strided_slice %40 {offsets = [0, 16], sizes = [8, 8], strides = [1, 1]} : vector<8x32xf32> to vector<8x8xf32>
    %44 = vector.extract_strided_slice %40 {offsets = [0, 24], sizes = [8, 8], strides = [1, 1]} : vector<8x32xf32> to vector<8x8xf32>
    %45 = vector.shape_cast %41 : vector<8x8xf32> to vector<1x8x8xf32>
    %46 = vector.shape_cast %42 : vector<8x8xf32> to vector<1x8x8xf32>
    %47 = vector.shape_cast %43 : vector<8x8xf32> to vector<1x8x8xf32>
    %48 = vector.shape_cast %44 : vector<8x8xf32> to vector<1x8x8xf32>
    %49 = tpu.concatenate %45, %46, %47, %48 in 0 : vector<1x8x8xf32>, vector<1x8x8xf32>, vector<1x8x8xf32>, vector<1x8x8xf32> -> vector<4x8x8xf32>
    %50 = arith.truncf %49 : vector<4x8x8xf32> to vector<4x8x8xbf16>
    %51 = vector.extract_strided_slice %37 {offsets = [0, 32], sizes = [8, 32], strides = [1, 1]} : vector<8x96xf32> to vector<8x32xf32>
    %52 = vector.extract_strided_slice %51 {offsets = [0, 0], sizes = [8, 8], strides = [1, 1]} : vector<8x32xf32> to vector<8x8xf32>
    %53 = vector.extract_strided_slice %51 {offsets = [0, 8], sizes = [8, 8], strides = [1, 1]} : vector<8x32xf32> to vector<8x8xf32>
    %54 = vector.extract_strided_slice %51 {offsets = [0, 16], sizes = [8, 8], strides = [1, 1]} : vector<8x32xf32> to vector<8x8xf32>
    %55 = vector.extract_strided_slice %51 {offsets = [0, 24], sizes = [8, 8], strides = [1, 1]} : vector<8x32xf32> to vector<8x8xf32>
    %56 = vector.shape_cast %52 : vector<8x8xf32> to vector<1x8x8xf32>
    %57 = vector.shape_cast %53 : vector<8x8xf32> to vector<1x8x8xf32>
    %58 = vector.shape_cast %54 : vector<8x8xf32> to vector<1x8x8xf32>
    %59 = vector.shape_cast %55 : vector<8x8xf32> to vector<1x8x8xf32>
    %60 = tpu.concatenate %56, %57, %58, %59 in 0 : vector<1x8x8xf32>, vector<1x8x8xf32>, vector<1x8x8xf32>, vector<1x8x8xf32> -> vector<4x8x8xf32>
    %61 = arith.truncf %60 : vector<4x8x8xf32> to vector<4x8x8xbf16>
    %62 = vector.extract_strided_slice %37 {offsets = [0, 64], sizes = [8, 32], strides = [1, 1]} : vector<8x96xf32> to vector<8x32xf32>
    %63 = vector.extract_strided_slice %62 {offsets = [0, 0], sizes = [8, 8], strides = [1, 1]} : vector<8x32xf32> to vector<8x8xf32>
    %64 = vector.extract_strided_slice %62 {offsets = [0, 8], sizes = [8, 8], strides = [1, 1]} : vector<8x32xf32> to vector<8x8xf32>
    %65 = vector.extract_strided_slice %62 {offsets = [0, 16], sizes = [8, 8], strides = [1, 1]} : vector<8x32xf32> to vector<8x8xf32>
    %66 = vector.extract_strided_slice %62 {offsets = [0, 24], sizes = [8, 8], strides = [1, 1]} : vector<8x32xf32> to vector<8x8xf32>
    %67 = vector.shape_cast %63 : vector<8x8xf32> to vector<1x8x8xf32>
    %68 = vector.shape_cast %64 : vector<8x8xf32> to vector<1x8x8xf32>
    %69 = vector.shape_cast %65 : vector<8x8xf32> to vector<1x8x8xf32>
    %70 = vector.shape_cast %66 : vector<8x8xf32> to vector<1x8x8xf32>
    %71 = tpu.concatenate %67, %68, %69, %70 in 0 : vector<1x8x8xf32>, vector<1x8x8xf32>, vector<1x8x8xf32>, vector<1x8x8xf32> -> vector<4x8x8xf32>
    %72 = arith.truncf %71 : vector<4x8x8xf32> to vector<4x8x8xbf16>
    "tpu.trace_start"() <{level = 10 : i32, message = "hqd,hkd->hqk"}> : () -> ()
    %cst_22 = arith.constant dense<0.000000e+00> : vector<4x8x8xf32>
    %73 = tpu.matmul %50, %61, %cst_22 {dimension_numbers = #tpu.dot_dimension_numbers<[2], [2], [1], [1], [0, 0, 0, 1, 1, 1], [0], [0]>} : vector<4x8x8xbf16>, vector<4x8x8xbf16>, vector<4x8x8xf32> -> vector<4x8x8xf32>
    "tpu.trace_stop"() : () -> ()
    %74 = vector.broadcast %9 : vector<1x1x8xf32> to vector<4x8x8xf32>
    %75 = arith.addf %73, %74 : vector<4x8x8xf32>
    %cst_23 = arith.constant dense<0xFF800000> : vector<4x8xf32>
    %76 = vector.multi_reduction <maximumf>, %75, %cst_23 [2] : vector<4x8x8xf32> to vector<4x8xf32>
    %77 = vector.shape_cast %76 : vector<4x8xf32> to vector<4x8x1xf32>
    %78 = vector.broadcast %77 : vector<4x8x1xf32> to vector<4x8x8xf32>
    %79 = arith.subf %75, %78 : vector<4x8x8xf32>
    %80 = math.exp %79 : vector<4x8x8xf32>
    %cst_24 = arith.constant dense<0.000000e+00> : vector<4x8xf32>
    %81 = vector.multi_reduction <add>, %80, %cst_24 [2] : vector<4x8x8xf32> to vector<4x8xf32>
    %82 = vector.shape_cast %81 : vector<4x8xf32> to vector<4x8x1xf32>
    %83 = tpu.reciprocal %82 {approx = true} : vector<4x8x1xf32> -> vector<4x8x1xf32>
    %84 = vector.broadcast %83 : vector<4x8x1xf32> to vector<4x8x8xf32>
    %85 = arith.mulf %80, %84 : vector<4x8x8xf32>
    %86 = arith.truncf %85 : vector<4x8x8xf32> to vector<4x8x8xbf16>
    "tpu.trace_start"() <{level = 10 : i32, message = "hqk,hkd->hqd"}> : () -> ()
    %cst_25 = arith.constant dense<0.000000e+00> : vector<4x8x8xf32>
    %87 = tpu.matmul %86, %72, %cst_25 {dimension_numbers = #tpu.dot_dimension_numbers<[2], [1], [1], [2], [0, 0, 0, 1, 1, 2], [0], [0]>} : vector<4x8x8xbf16>, vector<4x8x8xbf16>, vector<4x8x8xf32> -> vector<4x8x8xf32>
    "tpu.trace_stop"() : () -> ()
    %88 = vector.extract_strided_slice %87 {offsets = [0, 0, 0], sizes = [1, 8, 8], strides = [1, 1, 1]} : vector<4x8x8xf32> to vector<1x8x8xf32>
    %89 = vector.shape_cast %88 : vector<1x8x8xf32> to vector<8x8xf32>
    %90 = vector.extract_strided_slice %87 {offsets = [1, 0, 0], sizes = [1, 8, 8], strides = [1, 1, 1]} : vector<4x8x8xf32> to vector<1x8x8xf32>
    %91 = vector.shape_cast %90 : vector<1x8x8xf32> to vector<8x8xf32>
    %92 = vector.extract_strided_slice %87 {offsets = [2, 0, 0], sizes = [1, 8, 8], strides = [1, 1, 1]} : vector<4x8x8xf32> to vector<1x8x8xf32>
    %93 = vector.shape_cast %92 : vector<1x8x8xf32> to vector<8x8xf32>
    %94 = vector.extract_strided_slice %87 {offsets = [3, 0, 0], sizes = [1, 8, 8], strides = [1, 1, 1]} : vector<4x8x8xf32> to vector<1x8x8xf32>
    %95 = vector.shape_cast %94 : vector<1x8x8xf32> to vector<8x8xf32>
    %96 = tpu.concatenate %89, %91, %93, %95 in 1 : vector<8x8xf32>, vector<8x8xf32>, vector<8x8xf32>, vector<8x8xf32> -> vector<8x32xf32>
    %97 = arith.truncf %96 : vector<8x32xf32> to vector<8x32xbf16>
    %c0_26 = arith.constant 0 : index
    %c0_27 = arith.constant 0 : index
    %98 = vector.load %arg7[%c0_26, %c0_27] : memref<32x32xbf16, #tpu.memory_space<vmem>>, vector<32x32xbf16>
    %cst_28 = arith.constant dense<0.000000e+00> : vector<8x32xf32>
    %99 = tpu.matmul %97, %98, %cst_28 {dimension_numbers = #tpu.dot_dimension_numbers<[1], [0], [0], [1], [0, 0, 1, 1], [], []>} : vector<8x32xbf16>, vector<32x32xbf16>, vector<8x32xf32> -> vector<8x32xf32>
    %c0_29 = arith.constant 0 : index
    %c0_30 = arith.constant 0 : index
    %100 = vector.load %arg8[%c0_29, %c0_30] : memref<1x32xf32, #tpu.memory_space<vmem>>, vector<1x32xf32>
    %101 = vector.broadcast %100 : vector<1x32xf32> to vector<8x32xf32>
    %102 = arith.addf %99, %101 : vector<8x32xf32>
    %103 = arith.addf %1, %102 : vector<8x32xf32>
    %c0_31 = arith.constant 0 : index
    %c0_32 = arith.constant 0 : index
    %104 = vector.load %arg9[%c0_31, %c0_32] : memref<1x32xf32, #tpu.memory_space<vmem>>, vector<1x32xf32>
    %c0_33 = arith.constant 0 : index
    %c0_34 = arith.constant 0 : index
    %105 = vector.load %arg10[%c0_33, %c0_34] : memref<1x32xf32, #tpu.memory_space<vmem>>, vector<1x32xf32>
    %cst_35 = arith.constant dense<0.000000e+00> : vector<8xf32>
    %106 = vector.multi_reduction <add>, %103, %cst_35 [1] : vector<8x32xf32> to vector<8xf32>
    %107 = vector.shape_cast %106 : vector<8xf32> to vector<8x1xf32>
    %cst_36 = arith.constant 3.200000e+01 : f32
    %108 = vector.broadcast %cst_36 : f32 to vector<8x1xf32>
    %109 = arith.divf %107, %108 : vector<8x1xf32>
    %110 = vector.broadcast %109 : vector<8x1xf32> to vector<8x32xf32>
    %111 = arith.subf %103, %110 : vector<8x32xf32>
    %112 = arith.mulf %111, %111 : vector<8x32xf32>
    %cst_37 = arith.constant dense<0.000000e+00> : vector<8xf32>
    %113 = vector.multi_reduction <add>, %112, %cst_37 [1] : vector<8x32xf32> to vector<8xf32>
    %114 = vector.shape_cast %113 : vector<8xf32> to vector<8x1xf32>
    %cst_38 = arith.constant 3.100000e+01 : f32
    %115 = vector.broadcast %cst_38 : f32 to vector<8x1xf32>
    %116 = arith.divf %114, %115 : vector<8x1xf32>
    %117 = math.sqrt %116 : vector<8x1xf32>
    %118 = vector.broadcast %104 : vector<1x32xf32> to vector<8x32xf32>
    %119 = arith.mulf %118, %111 : vector<8x32xf32>
    %cst_39 = arith.constant 9.99999997E-7 : f32
    %120 = vector.broadcast %cst_39 : f32 to vector<8x1xf32>
    %121 = arith.addf %117, %120 : vector<8x1xf32>
    %122 = vector.broadcast %121 : vector<8x1xf32> to vector<8x32xf32>
    %123 = arith.divf %119, %122 : vector<8x32xf32>
    %124 = vector.broadcast %105 : vector<1x32xf32> to vector<8x32xf32>
    %125 = arith.addf %123, %124 : vector<8x32xf32>
    %126 = arith.truncf %125 : vector<8x32xf32> to vector<8x32xbf16>
    %c0_40 = arith.constant 0 : index
    %c0_41 = arith.constant 0 : index
    %127 = vector.load %arg11[%c0_40, %c0_41] : memref<32x64xbf16, #tpu.memory_space<vmem>>, vector<32x64xbf16>
    %cst_42 = arith.constant dense<0.000000e+00> : vector<8x64xf32>
    %128 = tpu.matmul %126, %127, %cst_42 {dimension_numbers = #tpu.dot_dimension_numbers<[1], [0], [0], [1], [0, 0, 1, 1], [], []>} : vector<8x32xbf16>, vector<32x64xbf16>, vector<8x64xf32> -> vector<8x64xf32>
    %c0_43 = arith.constant 0 : index
    %c0_44 = arith.constant 0 : index
    %129 = vector.load %arg12[%c0_43, %c0_44] : memref<1x64xf32, #tpu.memory_space<vmem>>, vector<1x64xf32>
    %130 = vector.broadcast %129 : vector<1x64xf32> to vector<8x64xf32>
    %131 = arith.addf %128, %130 : vector<8x64xf32>
    %cst_45 = arith.constant 0.000000e+00 : f32
    %132 = vector.broadcast %cst_45 : f32 to vector<8x64xf32>
    %133 = arith.maximumf %131, %132 : vector<8x64xf32>
    %134 = arith.truncf %133 : vector<8x64xf32> to vector<8x64xbf16>
    %c0_46 = arith.constant 0 : index
    %c0_47 = arith.constant 0 : index
    %135 = vector.load %arg13[%c0_46, %c0_47] : memref<64x32xbf16, #tpu.memory_space<vmem>>, vector<64x32xbf16>
    %cst_48 = arith.constant dense<0.000000e+00> : vector<8x32xf32>
    %136 = tpu.matmul %134, %135, %cst_48 {dimension_numbers = #tpu.dot_dimension_numbers<[1], [0], [0], [1], [0, 0, 1, 1], [], []>} : vector<8x64xbf16>, vector<64x32xbf16>, vector<8x32xf32> -> vector<8x32xf32>
    %c0_49 = arith.constant 0 : index
    %c0_50 = arith.constant 0 : index
    %137 = vector.load %arg14[%c0_49, %c0_50] : memref<1x32xf32, #tpu.memory_space<vmem>>, vector<1x32xf32>
    %138 = vector.broadcast %137 : vector<1x32xf32> to vector<8x32xf32>
    %139 = arith.addf %136, %138 : vector<8x32xf32>
    %140 = arith.addf %103, %139 : vector<8x32xf32>
    %c0_51 = arith.constant 0 : index
    %c0_52 = arith.constant 0 : index
    %c0_53 = arith.constant 0 : index
    %141 = vector.load %arg17[%c0_51, %c0_52, %c0_53] : memref<1x8x32xf32, #tpu.memory_space<vmem>>, vector<1x8x32xf32>
    %142 = vector.shape_cast %141 : vector<1x8x32xf32> to vector<8x32xf32>
    %143 = vector.shape_cast %140 : vector<8x32xf32> to vector<1x8x32xf32>
    tpu.vector_store %arg17[%c0_51, %c0_52, %c0_53], %143 {strides = array<i32>} : memref<1x8x32xf32, #tpu.memory_space<vmem>>, vector<1x8x32xf32>,
    return
  }
  func.func @transform_0(%arg0: i32) -> (i32, i32, i32) {
    %c0_i32 = arith.constant 0 : i32
    %c0_i32_0 = arith.constant 0 : i32
    %c0_i32_1 = arith.constant 0 : i32
    return %arg0, %c0_i32, %c0_i32_0 : i32, i32, i32
  }
  func.func @transform_1(%arg0: i32) -> (i32, i32, i32) {
    %c0_i32 = arith.constant 0 : i32
    %c0_i32_0 = arith.constant 0 : i32
    %c0_i32_1 = arith.constant 0 : i32
    return %arg0, %c0_i32, %c0_i32_0 : i32, i32, i32
  }
  func.func @transform_2(%arg0: i32) -> (i32, i32) {
    %c0_i32 = arith.constant 0 : i32
    %c0_i32_0 = arith.constant 0 : i32
    %c0_i32_1 = arith.constant 0 : i32
    return %c0_i32, %c0_i32_0 : i32, i32
  }
  func.func @transform_3(%arg0: i32) -> (i32, i32) {
    %c0_i32 = arith.constant 0 : i32
    %c0_i32_0 = arith.constant 0 : i32
    %c0_i32_1 = arith.constant 0 : i32
    return %c0_i32, %c0_i32_0 : i32, i32
  }
  func.func @transform_4(%arg0: i32) -> (i32, i32) {
    %c0_i32 = arith.constant 0 : i32
    %c0_i32_0 = arith.constant 0 : i32
    %c0_i32_1 = arith.constant 0 : i32
    return %c0_i32, %c0_i32_0 : i32, i32
  }
  func.func @transform_5(%arg0: i32) -> (i32, i32) {
    %c0_i32 = arith.constant 0 : i32
    %c0_i32_0 = arith.constant 0 : i32
    %c0_i32_1 = arith.constant 0 : i32
    return %c0_i32, %c0_i32_0 : i32, i32
  }
  func.func @transform_6(%arg0: i32) -> (i32, i32) {
    %c0_i32 = arith.constant 0 : i32
    %c0_i32_0 = arith.constant 0 : i32
    %c0_i32_1 = arith.constant 0 : i32
    return %c0_i32, %c0_i32_0 : i32, i32
  }
  func.func @transform_7(%arg0: i32) -> (i32, i32) {
    %c0_i32 = arith.constant 0 : i32
    %c0_i32_0 = arith.constant 0 : i32
    %c0_i32_1 = arith.constant 0 : i32
    return %c0_i32, %c0_i32_0 : i32, i32
  }
  func.func @transform_8(%arg0: i32) -> (i32, i32) {
    %c0_i32 = arith.constant 0 : i32
    %c0_i32_0 = arith.constant 0 : i32
    %c0_i32_1 = arith.constant 0 : i32
    return %c0_i32, %c0_i32_0 : i32, i32
  }
  func.func @transform_9(%arg0: i32) -> (i32, i32) {
    %c0_i32 = arith.constant 0 : i32
    %c0_i32_0 = arith.constant 0 : i32
    %c0_i32_1 = arith.constant 0 : i32
    return %c0_i32, %c0_i32_0 : i32, i32
  }
  func.func @transform_10(%arg0: i32) -> (i32, i32) {
    %c0_i32 = arith.constant 0 : i32
    %c0_i32_0 = arith.constant 0 : i32
    %c0_i32_1 = arith.constant 0 : i32
    return %c0_i32, %c0_i32_0 : i32, i32
  }
  func.func @transform_11(%arg0: i32) -> (i32, i32) {
    %c0_i32 = arith.constant 0 : i32
    %c0_i32_0 = arith.constant 0 : i32
    %c0_i32_1 = arith.constant 0 : i32
    return %c0_i32, %c0_i32_0 : i32, i32
  }
  func.func @transform_12(%arg0: i32) -> (i32, i32) {
    %c0_i32 = arith.constant 0 : i32
    %c0_i32_0 = arith.constant 0 : i32
    %c0_i32_1 = arith.constant 0 : i32
    return %c0_i32, %c0_i32_0 : i32, i32
  }
  func.func @transform_13(%arg0: i32) -> (i32, i32) {
    %c0_i32 = arith.constant 0 : i32
    %c0_i32_0 = arith.constant 0 : i32
    %c0_i32_1 = arith.constant 0 : i32
    return %c0_i32, %c0_i32_0 : i32, i32
  }
  func.func @transform_14(%arg0: i32) -> (i32, i32) {
    %c0_i32 = arith.constant 0 : i32
    %c0_i32_0 = arith.constant 0 : i32
    %c0_i32_1 = arith.constant 0 : i32
    return %c0_i32, %c0_i32_0 : i32, i32
  }
  func.func @transform_15(%arg0: i32) -> (i32, i32) {
    %c0_i32 = arith.constant 0 : i32
    %c0_i32_0 = arith.constant 0 : i32
    %c0_i32_1 = arith.constant 0 : i32
    return %c0_i32, %c0_i32_0 : i32, i32
  }
  func.func @transform_16(%arg0: i32) -> (i32, i32, i32) {
    %c0_i32 = arith.constant 0 : i32
    %c0_i32_0 = arith.constant 0 : i32
    %c0_i32_1 = arith.constant 0 : i32
    return %arg0, %c0_i32, %c0_i32_0 : i32, i32, i32
  }
}

</mosaic_0001>

<bundles_post_ra>
// kernel: tpu_custom_call.1
= control target key start
LH: loop header
LB: loop body
LE: loop exit
PB: predicated region body
PF: predicated region fallthrough
CT: control target
= control target key end

     0   :  { %s2706_s0 = inlined_call_operand.vmem [shape: f32[2,8,32], index: 0, kind: input, shape index: {}]   ;;  %s2707_s1 = inlined_call_operand.hbm [shape: f32[2,1,8], index: 1, kind: input, shape index: {}]   ;;  %s2708_s2 = inlined_call_operand.hbm [shape: f32[1,32], index: 2, kind: input, shape index: {}]   ;;  %s2709_s3 = inlined_call_operand.hbm [shape: f32[1,32], index: 3, kind: input, shape index: {}]   ;;  %s2710_s4 = inlined_call_operand.vmem [shape: bf16[32,96], index: 4, kind: input, shape index: {}]   ;;  %s2711_s5 = inlined_call_operand.hbm [shape: f32[1,96], index: 5, kind: input, shape index: {}]   ;;  %s2712_s6 = inlined_call_operand.vmem [shape: bf16[32,32], index: 6, kind: input, shape index: {}]   ;;  %s2713_s7 = inlined_call_operand.hbm [shape: f32[1,32], index: 7, kind: input, shape index: {}]   ;;  %s2714_s8 = inlined_call_operand.hbm [shape: f32[1,32], index: 8, kind: input, shape index: {}]   ;;  %s2715_s9 = inlined_call_operand.hbm [shape: f32[1,32], index: 9, kind: input, shape index: {}]   ;;  %s2716_s10 = inlined_call_operand.vmem [shape: bf16[32,64], index: 10, kind: input, shape index: {}]   ;;  %s2717_s11 = inlined_call_operand.vmem [shape: f32[1,64], index: 11, kind: input, shape index: {}]   ;;  %s2718_s12 = inlined_call_operand.vmem [shape: bf16[64,32], index: 12, kind: input, shape index: {}]   ;;  %s2719_s13 = inlined_call_operand.vmem [shape: f32[1,32], index: 13, kind: input, shape index: {}]   ;;  %s2720_s14 = inlined_call_operand.vmem [shape: f32[1,32], index: 14, kind: input, shape index: {}]   ;;  %s2721_s15 = inlined_call_operand.vmem [shape: f32[1,32], index: 15, kind: input, shape index: {}]   ;;  %s2722_s16 = inlined_call_operand.hbm [shape: f32[2,8,32], index: 16, kind: output, shape index: {}]  }
   0x1   :  { %2728 = sst [smem:[#allocation22_spill]] %s2706_s0 }
   0x2   :  { %2729 = sst [smem:[#allocation23_spill]] %s2708_s2 }
   0x3   :  { %2730 = sst [smem:[#allocation24_spill]] %s2709_s3 }
   0x4   :  { %2731 = sst [smem:[#allocation25_spill]] %s2711_s5 }
   0x5   :  { %2732 = sst [smem:[#allocation26_spill]] %s2713_s7 }
   0x6   :  { %2733 = sst [smem:[#allocation27_spill]] %s2714_s8 }
   0x7   :  { %2734 = sst [smem:[#allocation28_spill]] %s2715_s9 }
   0x8   :  { %21 = vsyncpa [#allocation3], 0 }
   0x9   :  { %23 = vsyncpa [#allocation3 + $0x1], 0 }
   0xa   :  { %24 = vsyncpa [#allocation6], 0 }
   0xb   :  { %25 = vsyncpa [#allocation9], 0 }
   0xc   :  { %26 = vsyncpa [#allocation12], 0 }
   0xd   :  { %27 = vsyncpa [#allocation4], 0 }
   0xe   :  { %29 = vsyncpa [#allocation4 + $0x1], 0  ;;  %s2318_s21 = smov 0   ;;  %s2320_s22 = smov 0  }
   0xf   :  { %s2322_s23 = smov 0   ;;  %s2324_s14 = smov 0  }
  0x10 LB: > { %2735 = sst [smem:[#allocation20_spill]] %s2209_s23  ;;  %s2215_s15 = smov [#allocation5]   ;;  %s2213_s14 = sphi %s2324_s14, %s2768_s14   ;;  %s2209_s23 = sphi %s2322_s23, %s2765_s23   ;;  %s2205_s22 = sphi %s2320_s22, %s2767_s22   ;;  %s2201_s21 = sphi %s2318_s21, %s2766_s21  }
  0x11   : > { %s425_s24 = sshll.u32 %s2215_s15, 4  ;;  %s2339_s25 = sadd.s32 4294967295, %s2213_s14   ;;  %s426_s24 = int_to_ptr.vmem [resolvable:$true] %s425_s24 }
  0x12   : > { %p1636_p0 = scmp.ge.s32.totalorder %s2213_s14, 1  ;;  %p2723_p1 = scmp.eq.s32.totalorder %s2339_s25, 0 }
  0x13   : > { %p412_p2 = scmp.lt.s32.totalorder %s2213_s14, 3  ;;  %s2216_s27 = smov [#allocation8]  }
  0x14   : > { %s450_s28 = sshll.u32 %s2216_s27, 4  ;;  %s2217_s29 = smov [#allocation11]   ;;  %s2351_s28 = int_to_ptr.vmem [resolvable:$true] %s450_s28 }
  0x15   : > { %p2344_p3 = pnand %p1636_p0, %p412_p2  ;;  %s475_s30 = sshll.u32 %s2217_s29, 4  ;;  %s2359_s30 = int_to_ptr.vmem [resolvable:$true] %s475_s30 }
  0x16   : > { %s2218_s17 = smov [#allocation7]   ;;  %s1964_s20 = scalar_lea.vmem %s426_s24, 16 }
  0x17   : > { %s2736_s26 = scalar_select %p2344_p3, 1, 0 }
  0x18   : > { %p1830_p5 = pneg %p2344_p3  ;;  %s2361_s18 = sshll.u32 %s2218_s17, 4  ;;  %s437_s18 = int_to_ptr.vmem [resolvable:$true] %s2361_s18 }
  0x19   : > { %p1965_p8 = scmp.ne.s32.totalorder %s426_s24, %s1964_s20  ;;  %s1971_s15 = scalar_lea.vmem %s426_s24, 32 }
  0x1a   : > { %p2355_p6 = pnand %p1830_p5, %p2723_p1  ;;  %p1972_p11 = scmp.lt.s32.totalorder %s426_s24, %s426_s24 }
  0x1b   : > { %p1973_p12 = scmp.lt.s32.totalorder %s1971_s15, %s1964_s20 }
  0x1c   : > { %p2365_p7 = pneg %p2355_p6 }
  0x1d   : > { %p1974_p13 = por %p1973_p12, %p1972_p11 }
  0x1e   : > { %p1967_p9 = pnand %p1965_p8, %p2365_p7 }
  0x20   : > { %p1968_p10 = pneg %p1967_p9 }
  0x22   : > { %p1975_p0 = pnand %p1974_p13, %p1968_p10 }
  0x24   : > { %1978 = shalt.err (!%p1975_p0)
}
  0x25   : > { %s2739_s2 = sld [smem:[#allocation23_spill]]  ;;  %s1990_s17 = scalar_lea.vmem %s2351_s28, 16 }
  0x26   : > { %p1991_p2 = scmp.ne.s32.totalorder %s2351_s28, %s1990_s17  ;;  %s1997_s20 = scalar_lea.vmem %s2351_s28, 32 }
  0x27   : > { %p1998_p9 = scmp.lt.s32.totalorder %s2351_s28, %s2351_s28  ;;  %p1999_p10 = scmp.lt.s32.totalorder %s1997_s20, %s1990_s17 }
  0x28   : > { %p1993_p5 = pnand %p1991_p2, %p2365_p7 }
  0x29   : > { %p2000_p11 = por %p1999_p10, %p1998_p9 }
  0x2a   : > { %p1994_p8 = pneg %p1993_p5 }
  0x2b   : > { %1833 = dma.hbm_to_vmem [thread:$0]  (!%p2355_p6), %s2739_s2, 16, %s426_s24, [#allocation6]  }
  0x2c   : > { %p2001_p12 = pnand %p2000_p11, %p1994_p8 }
  0x2e   : > { %2004 = shalt.err (!%p2001_p12)
}
  0x2f   : > { %s2740_s5 = sld [smem:[#allocation25_spill]]  ;;  %s2016_s24 = scalar_lea.vmem %s2359_s30, 16 }
  0x30   : > { %p2017_p13 = scmp.ne.s32.totalorder %s2359_s30, %s2016_s24  ;;  %s2023_s29 = scalar_lea.vmem %s2359_s30, 32 }
  0x31   : > { %p2024_p5 = scmp.lt.s32.totalorder %s2359_s30, %s2359_s30  ;;  %p2025_p8 = scmp.lt.s32.totalorder %s2023_s29, %s2016_s24 }
  0x32   : > { %p2019_p0 = pnand %p2017_p13, %p2365_p7 }
  0x33   : > { %p2026_p9 = por %p2025_p8, %p2024_p5 }
  0x34   : > { %p2020_p2 = pneg %p2019_p0 }
  0x35   : > { %1839 = dma.hbm_to_vmem [thread:$0]  (!%p2355_p6), %s2740_s5, 16, %s2351_s28, [#allocation9]  }
  0x36   : > { %p2027_p10 = pnand %p2026_p9, %p2020_p2 }
  0x38   : > { %2030 = shalt.err (!%p2027_p10)
}
  0x39   : > { %s2741_s8 = sld [smem:[#allocation27_spill]]  ;;  %s2219_s28 = smov [#allocation10]  }
  0x3a   : > { %s464_s15 = sshll.u32 %s2219_s28, 4  ;;  %s2042_s27 = scalar_lea.vmem %s437_s18, 16  ;;  %s465_s15 = int_to_ptr.vmem [resolvable:$true] %s464_s15 }
  0x3b   : > { %p2043_p11 = scmp.ne.s32.totalorder %s437_s18, %s2042_s27  ;;  %s2049_s24 = scalar_lea.vmem %s437_s18, 32 }
  0x3c   : > { %p2050_p0 = scmp.lt.s32.totalorder %s437_s18, %s437_s18  ;;  %p2051_p2 = scmp.lt.s32.totalorder %s2049_s24, %s2042_s27 }
  0x3d   : > { %p2045_p12 = pnand %p2043_p11, %p2365_p7 }
  0x3e   : > { %p2052_p5 = por %p2051_p2, %p2050_p0 }
  0x3f   : > { %1845 = dma.hbm_to_vmem [thread:$0]  (!%p2355_p6), %s2741_s8, 16, %s2359_s30, [#allocation12]  }
  0x40   : > { %p2046_p13 = pneg %p2045_p12 }
  0x42   : > { %p2053_p8 = pnand %p2052_p5, %p2046_p13 }
  0x44   : > { %2056 = shalt.err (!%p2053_p8)
}
  0x45   : > { %s2742_s3 = sld [smem:[#allocation24_spill]]  ;;  %s2068_s30 = scalar_lea.vmem %s465_s15, 16 }
  0x46   : > { %p2069_p9 = scmp.ne.s32.totalorder %s465_s15, %s2068_s30  ;;  %s2075_s20 = scalar_lea.vmem %s465_s15, 32 }
  0x47   : > { %p2076_p12 = scmp.lt.s32.totalorder %s465_s15, %s465_s15  ;;  %p2077_p4 = scmp.lt.s32.totalorder %s2075_s20, %s2068_s30 }
  0x48   : > { %p2071_p10 = pnand %p2069_p9, %p2365_p7 }
  0x49   : > { %p2078_p1 = por %p2077_p4, %p2076_p12 }
  0x4a   : > { %p2072_p11 = pneg %p2071_p10 }
  0x4b   : > { %1836 = dma.hbm_to_vmem [thread:$0]  (!%p2355_p6), %s2742_s3, 16, %s437_s18, [#allocation6]  }
  0x4c   : > { %p2079_p0 = pnand %p2078_p1, %p2072_p11 }
  0x4e   : > { %2082 = shalt.err (!%p2079_p0)
}
  0x4f   : > { %s2743_s7 = sld [smem:[#allocation26_spill]]  ;;  %s2220_s18 = smov [#allocation13]  }
  0x50   : > { %s486_s24 = sshll.u32 %s2220_s18, 4  ;;  %s487_s24 = int_to_ptr.vmem [resolvable:$true] %s486_s24 }
  0x51   : > { %s2094_s29 = scalar_lea.vmem %s487_s24, 16  ;;  %s2101_s17 = scalar_lea.vmem %s487_s24, 32 }
  0x52   : > { %p2095_p13 = scmp.ne.s32.totalorder %s487_s24, %s2094_s29  ;;  %p2102_p8 = scmp.lt.s32.totalorder %s487_s24, %s487_s24 }
  0x53   : > { %p2103_p4 = scmp.lt.s32.totalorder %s2101_s17, %s2094_s29 }
  0x54   : > { %p2097_p2 = pnand %p2095_p13, %p2365_p7 }
  0x55   : > { %1842 = dma.hbm_to_vmem [thread:$0]  (!%p2355_p6), %s2743_s7, 16, %s465_s15, [#allocation9]  }
  0x56   : > { %p2098_p5 = pneg %p2097_p2  ;;  %p2104_p1 = por %p2103_p4, %p2102_p8 }
  0x58   : > { %p2105_p9 = pnand %p2104_p1, %p2098_p5 }
  0x5a   : > { %2108 = shalt.err (!%p2105_p9)
}
  0x5b   : > { %s2744_s9 = sld [smem:[#allocation28_spill]]  ;;  %s1635_s19 = sadd.s32 4294967294, %s2213_s14  }
  0x5c   : > { %s2426_s0 = sadd.s32 1, %s2213_s14   ;;  %s68_s28 = sadd.s32 1, %s2209_s23 }
  0x5d   : > { %s65_s15 = ssub.s32 %s2213_s14, %s2426_s0  ;;  %p75_p10 = scmp.ne.s32.totalorder %s2209_s23, %s2205_s22 }
  0x5e   : > { %p66_p7 = scmp.eq.s32.totalorder %s65_s15, 0  ;;  %p76_p11 = scmp.eq.s32.totalorder %s2213_s14, 0 }
  0x5f   : > { %p81_p12 = scmp.ne.s32.totalorder %s2205_s22, %s2201_s21  ;;  %p2747_p13 = scmp.eq.s32.totalorder %s2339_s25, 0 }
  0x60   : > { %s2437_s27 = scalar_select %p66_p7, %s2209_s23, %s68_s28  }
  0x61   : > { %1848 = dma.hbm_to_vmem [thread:$0]  (!%p2355_p6), %s2744_s9, 16, %s487_s24, [#allocation12]  }
  0x62   : > { %2745 = sst [smem:[#allocation21_spill]] %s2437_s27  ;;  %p2439_p0 = por %p76_p11, %p75_p10 }
  0x63   : > { %p2445_p6 = por %p2747_p13, %p81_p12  ;;  %p399_p2 = scmp.eq.s32.totalorder %s2339_s25, 1 }
  0x64   : > { %p405_p5 = scmp.eq.s32.totalorder %s1635_s19, 1  ;;  %p1863_p8 = scmp.lt.s32.totalorder %s2213_s14, 2 }
  0x65   : > { %s2748_s24 = scalar_select %p2445_p6, 1, 0 }
  0x66   : > { %s522_s29 = sand.u32 1, %s2209_s23   ;;  %p2452_p4 = por %p399_p2, %p75_p10 }
  0x67   : > { %p2456_p1 = por %p405_p5, %p81_p12  ;;  %s1644_s20 = sshll.u32 %s2213_s14, 4 }
  0x68   : > { %s2749_s17 = scalar_select %p2452_p4, 1, 0 }
  0x69   : > { %s2750_s30 = scalar_select %p2456_p1, 1, 0 }
  0x6a   : > { %s525_s15 = scalar_lea.vmem [#allocation2], %s522_s29  ;;  %s2464_s5 = scalar_lea.hbm %s2707_s1, %s1644_s20 }
  0x6b   : > { %s532_s28 = sshll.u32 %s525_s15, 4  ;;  %p2468_p9 = pnand %p1863_p8, %p2439_p0  ;;  %s533_s28 = int_to_ptr.vmem [resolvable:$true] %s532_s28 }
  0x6c   : > { %s523_s7 = scalar_lea.sflag [#allocation3], %s522_s29  ;;  %s2109_s8 = scalar_lea.hbm %s2464_s5, 16 }
  0x6d   : > { %p2110_p7 = scmp.ne.s32.totalorder %s2464_s5, %s2109_s8  ;;  %p2111_p10 = pneg %p2468_p9 }
  0x6e   : > { %s2114_s20 = scalar_lea.hbm %s2707_s1, 32  ;;  %p2115_p13 = scmp.lt.s32.totalorder %s2464_s5, %s2707_s1 }
  0x6f   : > { %p2112_p11 = pnand %p2111_p10, %p2110_p7  ;;  %p2116_p0 = scmp.lt.s32.totalorder %s2114_s20, %s2109_s8 }
  0x71   : > { %p2113_p12 = pneg %p2112_p11  ;;  %p2117_p2 = por %p2116_p0, %p2115_p13 }
  0x73   : > { %p2118_p5 = pnand %p2117_p2, %p2113_p12 }
  0x75   : > { %2121 = shalt.err (!%p2118_p5)
}
  0x76   : > { %s2122_s18 = scalar_lea.vmem %s533_s28, 16  ;;  %s2221_s29 = smov [#allocation2]  }
  0x77   : > { %p2123_p8 = scmp.ne.s32.totalorder %s533_s28, %s2122_s18  ;;  %s2127_s27 = sshll.u32 %s2221_s29, 4  ;;  %s2128_s27 = int_to_ptr.vmem [resolvable:$false] %s2127_s27 }
  0x78   : > { %s2129_s23 = scalar_lea.vmem %s2128_s27, 32  ;;  %p2130_p7 = scmp.lt.s32.totalorder %s533_s28, %s2128_s27 }
  0x79   : > { %p2125_p1 = pnand %p2123_p8, %p2111_p10  ;;  %p2131_p11 = scmp.lt.s32.totalorder %s2129_s23, %s2122_s18 }
  0x7b   : > { %p2126_p4 = pneg %p2125_p1  ;;  %p2132_p6 = por %p2131_p11, %p2130_p7 }
  0x7d   : > { %p2133_p3 = pnand %p2132_p6, %p2126_p4 }
  0x7f   : > { %2136 = shalt.err (!%p2133_p3)
}
  0x80   : > { %1852 = dma.hbm_to_vmem [thread:$0]  (!%p2468_p9), %s2464_s5, 16, %s533_s28, %s523_s7  }
  0x81   : > { %p2752_p12 = scmp.ne.s32.totalorder %s2736_s26, 0 }
  0x82   : > { %s2489_s8 = sand.u32 (!%p2752_p12), 1, %s2205_s22   ;;  %p2753_p1 = scmp.ne.s32.totalorder (!%p2752_p12), %s2748_s24, 0 }
  0x83   : > { %541 = sbr.rel (%p2752_p12) target bundleno = 2676 (0xa74), region = 84  ;;  %s544_s9 = scalar_lea.sflag (!%p2752_p12), [#allocation3], %s2489_s8 }
  0x84   : > { %s546_s2 = scalar_lea.vmem (!%p2752_p12), [#allocation2], %s2489_s8 }
  0x88   : > { %2180 = dma.done.wait (%p2753_p1), %s544_s9, 16  }
  0x89   : > { %2182 = vsyncadd (%p2753_p1), %s544_s9, 4294967280  ;;  %p2754_p3 = scmp.eq.s32.totalorder %s2339_s25, 0 }
  0x8b   : > { %2184 = dma.done.wait (%p2754_p3), [#allocation6], 32   ;;  %p2755_p6 = pmov %p2754_p3 }
  0x8c   : > { %p2756_p4 = pmov %p2754_p3 }
  0x8d   : > { %2186 = vsyncadd (%p2755_p6), [#allocation6], 4294967264 }
  0x8e   : > { %2188 = dma.done.wait (%p2756_p4), [#allocation9], 32   ;;  %p2757_p9 = pmov %p2754_p3 }
  0x8f   : > { %p2758_p10 = pmov %p2754_p3 }
  0x90   : > { %2190 = vsyncadd (%p2757_p9), [#allocation9], 4294967264 }
  0x91   : > { %2192 = dma.done.wait (%p2758_p10), [#allocation12], 32   ;;  %p2759_p13 = pmov %p2754_p3 }
  0x92   : > { %p622_p0 = scmp.lt.s32.totalorder %s2339_s25, 1  ;;  %s2760_s27 = sld [smem:[#allocation22_spill]]  ;;  %vm633_vm0 = vcmask 261120   ;;  %v1919_v7 = vld [vmem:[%s2710_s4 + $0x8] sm:$0xff]   ;;  %v2222_v8 = vmov 0.0   ;;  %vm2223_vm1 = vmmov 0   ;;  %v767_v54 = vlaneseq }
  0x93   : > { %2194 = vsyncadd (%p2759_p13), [#allocation12], 4294967264  ;;  %1718 = vmatprep.subr.bf16.mxu0 %v2222_v8  ;;  %1722 = vmatprep.mubr.msk.bf16.mxu0 %vm2223_vm1, %v2222_v8  ;;  %v1920_v9 = vld [vmem:[%s2710_s4] sm:$0xff]   ;;  %s2224_s15 = smov 104   ;;  %s2225_s18 = smov 120   ;;  %vm775_vm4 = vcmask 64512  }
  0x94   : > { %s623_s5 = scalar_select %p622_p0, %s2339_s25, 1  ;;  %1719 = vmatpush3.bf16.msra.mxu0 %v1919_v7  ;;  %1726 = vmatprep.subr.bf16.mxu1 %v2222_v8  ;;  %v1654_v18 = vld [vmem:[#allocation5] ss:$0 sm:$0xff]  ;;  %v1655_v21 = vld [vmem:[#allocation7] ss:$0 sm:$0xff]  ;;  %v768_v56 = vshrl.u32 %v767_v54, 7 }
  0x95   : > { %1720 = vmatprep.subr.bf16.mxu0 %v2222_v8  ;;  %1728 = vmatprep.mubr.msk.bf16.mxu1 %vm2223_vm1, %v2222_v8  ;;  %v1656_v25 = vld [vmem:[#allocation8] ss:$0 sm:$0xff]  ;;  %s2226_s29 = smov 112   ;;  %s2227_s9 = smov 96   ;;  %v628_v55 = vld [vmem:[%s546_s2] sm:$0x1] }
  0x96   : > { %s1653_s7 = sshll.u32 %s623_s5, 3  ;;  %vm629_vm5 = vcmp.eq.f32.partialorder %v628_v55, 0.0  ;;  %v769_v57 = vsub.s32 0, %v768_v56  ;;  %s2228_s2 = smov 64   ;;  %vm1022_vm6 = vcmask 1043456   ;;  %vm1223_vm7 = vcmask 130048  }
  0x97   : > { %v630_v58 = vsel %vm629_vm5, -1e+09, %v2222_v8  ;;  %s2231_s28 = smov 24   ;;  %vm1225_vm8 = vcmask 195584   ;;  %vm1439_vm11 = vcmask 523264   ;;  %s1685_s20 = sshll.u32 %s2339_s25, 7 }
  0x98   : > { %s625_s24 = scalar_lea.vmem %s2760_s27, %s1653_s7  ;;  %1721 = vmatpush3.bf16.msra.mxu0 %v1920_v9  ;;  %v770_v59 = vrot.slane %v630_v58, %v769_v57  ;;  %s2229_s27 = smov 8  }
  0x99   : > { %v2514_v0 = vld [vmem:[%s625_s24] sm:$0xff]  ;;  %1732 = vmatprep.subr.bf16.mxu0 %v2222_v8  ;;  %s2230_s24 = smov 16   ;;  %s1486_s25 = scalar_lea.sflag [#allocation4], %s2489_s8 }
  0x9a   : > { %v634_v1 = vsel %vm633_vm0, %v2514_v0, 0.0  ;;  %p2761_p5 = scmp.ne.s32.totalorder %s2749_s17, 0  ;;  %s2232_s7 = smov [#allocation14]  }
  0x9b   : > { %635 = vadd.xlane.f32.xlu0 %v634_v1  ;;  %s2141_s23 = sshll.u32 %s2232_s7, 4  ;;  %s2142_s23 = int_to_ptr.vmem [resolvable:$false] %s2141_s23 }
  0x9c   : > { %s2143_s26 = scalar_lea.vmem %s2142_s23, 256 }
 0x124   : > { %v636_v2 = vpop.xlane.xlu0 %635 }
 0x125   : > { %v638_v3 = vmul.f32 0.03125, %v636_v2 }
 0x127   : > { %v639_v4 = vsub.f32 %v2514_v0, %v638_v3 }
 0x129   : > { %v640_v5 = vmul.f32 %v639_v4, %v639_v4  ;;  %v659_v19 = vmul.f32 %v1654_v18, %v639_v4 }
 0x12b   : > { %v641_v6 = vsel %vm633_vm0, %v640_v5, 0.0 }
 0x12c   : > { %642 = vadd.xlane.f32.xlu0 %v641_v6 }
 0x1b5   : > { %v643_v10 = vpop.xlane.xlu0 %642 }
 0x1b6   : > { %v645_v11 = vmul.f32 0.032258064, %v643_v10 }
 0x1b8   : > { %1929 = vrsqrt.f32 %v645_v11  ;;  %vm648_vm2 = vcmp.eq.f32.partialorder %v645_v11, inf  ;;  %v651_v14 = vand.u32 2147483648, %v645_v11  ;;  %vm650_vm3 = vcmp.eq.f32.partialorder %v645_v11, 0.0 }
 0x1c5   : > { %v1930_v12 = vpop.eup %1929 }
 0x1c6   : > { %v647_v13 = vmul.f32 %v1930_v12, %v645_v11 }
 0x1c8   : > { %v649_v15 = vsel %vm648_vm2, %v645_v11, %v647_v13 }
 0x1c9   : > { %v652_v16 = vsel %vm650_vm3, %v651_v14, %v649_v15 }
 0x1ca   : > { %v660_v17 = vadd.f32 1e-06, %v652_v16 }
 0x1cc   : > { %1931 = vrcp.f32 %v660_v17 }
 0x1d9   : > { %v1932_v20 = vpop.eup %1931 }
 0x1da   : > { %v662_v22 = vmul.f32 %v1932_v20, %v659_v19 }
 0x1dc   : > { %v669_v23 = vadd.f32 %v1655_v21, %v662_v22 }
 0x1de   : > { %v670_v24 = vpack.c.bf16 %v669_v23, %v669_v23 }
 0x1e0   : > { %1723 = vmatmul.mubr.msk.bf16.vlgmr.msra.gmra.mxu0 %vm633_vm0, %v670_v24 }
 0x1e1   : > { %1734 = vmatprep.mubr.msk.bf16.mxu0 %vm2223_vm1, %v2222_v8 }
 0x2a0   : > { %v731_v26 = vpop.f32.mrf.mxu0 }
 0x2a1   : > { %v732_v27 = vadd.f32 %v1656_v25, %v731_v26 }
 0x2a2   : > { %v1724_v28 = vpop.f32.mrf.mxu0 }
 0x2a3   : > { %759 = vrot.lane.b32.xlu0 %v732_v27, %s2224_s15  ;;  %753 = vrot.lane.b32.xlu1 %v732_v27, %s2225_s18  ;;  %v737_v30 = vmul.f32 0.35355338, %v732_v27  ;;  %v2537_v32 = vpack.c.bf16 %v732_v27, %v732_v27 }
 0x2a4   : > { %v734_v29 = vpop.f32.mrf.mxu0 }
 0x2a5   : > { %v748_v41 = vpack.c.bf16 %v737_v30, %v737_v30 }
 0x2a6   : > { %v1725_v31 = vpop.f32.mrf.mxu0 }
 0x2a7   : > { %756 = vrot.lane.b32.xlu1 %v732_v27, %s2226_s29  ;;  %745 = vrot.lane.b32.xlu0 %v737_v30, %s2224_s15 }
 0x2ab   : > { %773 = vrot.lane.b32.xlu1 %v2537_v32, %s2227_s9 }
 0x2af   : > { %739 = vrot.lane.b32.xlu1 %v737_v30, %s2225_s18 }
 0x315   : > { %v754_v33 = vpop.permute.xlu1 %753  ;;  %v760_v37 = vpop.permute.xlu0 %759 }
 0x316   : > { %v2540_v34 = vpack.c.bf16 %v754_v33, %v754_v33  ;;  %v2546_v39 = vpack.c.bf16 %v760_v37, %v760_v37 }
 0x318   : > { %823 = vrot.lane.b32.xlu1 %v2540_v34, %s2227_s9 }
 0x319   : > { %v757_v35 = vpop.permute.xlu1 %756  ;;  %v746_v50 = vpop.permute.xlu0 %745 }
 0x31a   : > { %v2543_v36 = vpack.c.bf16 %v757_v35, %v757_v35  ;;  %v751_v53 = vpack.c.bf16 %v746_v50, %v746_v50 }
 0x31c   : > { %872 = vrot.lane.b32.xlu1 %v2543_v36, %s2227_s9 }
 0x31d   : > { %v774_v38 = vpop.permute.xlu1 %773 }
 0x31e   : > { %v780_v40 = vsel %vm775_vm4, %v774_v38, 0 }
 0x31f   : > { %1727 = vmatpush3.bf16.xpose.msra.mxu1 %v780_v40 }
 0x320   : > { %921 = vrot.lane.b32.xlu1 %v2546_v39, %s2227_s9  ;;  %1738 = vmatprep.subr.bf16.mxu1 %v2222_v8 }
 0x321   : > { %v740_v42 = vpop.permute.xlu1 %739 }
 0x322   : > { %v749_v47 = vpack.c.bf16 %v740_v42, %v740_v42 }
 0x324   : > { %742 = vrot.lane.b32.xlu1 %v737_v30, %s2226_s29 }
 0x326   : > { %1729 = vmatmul.mubr.msk.bf16.vlgmr.msra.gmra.mxu1 %vm775_vm4, %v748_v41 }
 0x327   : > { %1740 = vmatprep.mubr.msk.bf16.mxu1 %vm2223_vm1, %v2222_v8 }
 0x38a   : > { %v824_v43 = vpop.permute.xlu1 %823 }
 0x38b   : > { %v829_v44 = vsel %vm775_vm4, %v824_v43, 0 }
 0x38c   : > { %1733 = vmatpush3.bf16.xpose.msra.mxu0 %v829_v44 }
 0x38d   : > { %1744 = vmatprep.subr.bf16.mxu0 %v2222_v8 }
 0x38e   : > { %v873_v45 = vpop.permute.xlu1 %872 }
 0x38f   : > { %v878_v46 = vsel %vm775_vm4, %v873_v45, 0 }
 0x390   : > { %1739 = vmatpush3.bf16.xpose.msra.mxu1 %v878_v46 }
 0x391   : > { %1750 = vmatprep.subr.bf16.mxu1 %v2222_v8 }
 0x392   : > { %v922_v48 = vpop.permute.xlu1 %921 }
 0x393   : > { %v927_v49 = vsel %vm775_vm4, %v922_v48, 0  ;;  %1735 = vmatmul.mubr.msk.bf16.vlgmr.msra.gmra.mxu0 %vm775_vm4, %v749_v47 }
 0x394   : > { %1745 = vmatpush3.bf16.xpose.msra.mxu0 %v927_v49  ;;  %1746 = vmatprep.mubr.msk.bf16.mxu0 %vm2223_vm1, %v2222_v8 }
 0x395   : > { %1756 = vmatprep.subr.bf16.mxu0 %v2222_v8 }
 0x396   : > { %v743_v51 = vpop.permute.xlu1 %742 }
 0x397   : > { %v750_v52 = vpack.c.bf16 %v743_v51, %v743_v51 }
 0x399   : > { %1741 = vmatmul.mubr.msk.bf16.vlgmr.msra.gmra.mxu1 %vm775_vm4, %v750_v52 }
 0x39a   : > { %1752 = vmatprep.mubr.msk.bf16.mxu1 %vm2223_vm1, %v2222_v8 }
 0x39b   : > { %1747 = vmatmul.mubr.msk.bf16.vlgmr.msra.gmra.mxu0 %vm775_vm4, %v751_v53 }
 0x39c   : > { %1758 = vmatprep.mubr.msk.bf16.mxu0 %vm2223_vm1, %v2222_v8 }
 0x3e6   : > { %v816_v60 = vpop.f32.mrf.mxu1 }
 0x3e7   : > { %v817_v61 = vadd.f32 %v816_v60, %v770_v59 }
 0x3e8   : > { %v1730_v62 = vpop.f32.mrf.mxu1 }
 0x3e9   : > { %v969_v63 = vsel %vm775_vm4, %v817_v61, -inf }
 0x3ea   : > { %970 = vmax.xlane.f32.xlu1 %v969_v63  ;;  %v819_v1 = vpop.f32.mrf.mxu1 }
 0x3ec   : > { %v1731_v2 = vpop.f32.mrf.mxu1 }
 0x453   : > { %v865_v3 = vpop.f32.mrf.mxu0 }
 0x454   : > { %v866_v4 = vadd.f32 %v865_v3, %v770_v59 }
 0x455   : > { %v1736_v5 = vpop.f32.mrf.mxu0 }
 0x456   : > { %v972_v6 = vsel %vm775_vm4, %v866_v4, -inf }
 0x457   : > { %973 = vmax.xlane.f32.xlu0 %v972_v6  ;;  %v868_v7 = vpop.f32.mrf.mxu0 }
 0x458   : > { %v1921_v7 = vld [vmem:[%s2712_s6 + $0x8] sm:$0xff]  }
 0x459   : > { %v1737_v9 = vpop.f32.mrf.mxu0  ;;  %v914_v10 = vpop.f32.mrf.mxu1 }
 0x45a   : > { %v915_v11 = vadd.f32 %v914_v10, %v770_v59  ;;  %v1922_v9 = vld [vmem:[%s2712_s6] sm:$0xff]  }
 0x45b   : > { %v1742_v12 = vpop.f32.mrf.mxu1  ;;  %v963_v13 = vpop.f32.mrf.mxu0 }
 0x45c   : > { %v964_v14 = vadd.f32 %v963_v13, %v770_v59  ;;  %v975_v15 = vsel %vm775_vm4, %v915_v11, -inf }
 0x45d   : > { %v917_v16 = vpop.f32.mrf.mxu1  ;;  %976 = vmax.xlane.f32.xlu0 %v975_v15  ;;  %v1748_v17 = vpop.f32.mrf.mxu0 }
 0x45e   : > { %v978_v18 = vsel %vm775_vm4, %v964_v14, -inf }
 0x45f   : > { %v1743_v19 = vpop.f32.mrf.mxu1  ;;  %979 = vmax.xlane.f32.xlu1 %v978_v18  ;;  %v966_v20 = vpop.f32.mrf.mxu0 }
 0x461   : > { %v1749_v21 = vpop.f32.mrf.mxu0 }
 0x470   : > { %1066 = vrot.lane.b32.xlu1 %v2540_v34, %s2228_s2 }
 0x473   : > { %1017 = vrot.lane.b32.xlu0 %v2537_v32, %s2228_s2  ;;  %v971_v22 = vpop.xlane.xlu1 %970 }
 0x474   : > { %v981_v23 = vsub.f32 %v817_v61, %v971_v22 }
 0x476   : > { %v985_v24 = vmul.f32 1.442695, %v981_v23 }
 0x478   : > { %1933 = vpow2.f32 %v985_v24 }
 0x485   : > { %v1934_v25 = vpop.eup %1933 }
 0x486   : > { %v993_v26 = vsel %vm775_vm4, %v1934_v25, 0.0 }
 0x492   : > { %994 = vadd.xlane.f32.xlu0 %v993_v26 }
 0x4e0   : > { %v974_v27 = vpop.xlane.xlu0 %973 }
 0x4e1   : > { %v982_v28 = vsub.f32 %v866_v4, %v974_v27 }
 0x4e3   : > { %v987_v29 = vmul.f32 1.442695, %v982_v28 }
 0x4e5   : > { %1935 = vpow2.f32 %v987_v29  ;;  %v1668_v29 = vld [vmem:[#allocation10] ss:$0 sm:$0xff] }
 0x4e6   : > { %v977_v30 = vpop.xlane.xlu0 %976 }
 0x4e7   : > { %v983_v31 = vsub.f32 %v915_v11, %v977_v30 }
 0x4e8   : > { %v980_v33 = vpop.xlane.xlu1 %979 }
 0x4e9   : > { %v989_v34 = vmul.f32 1.442695, %v983_v31  ;;  %v984_v35 = vsub.f32 %v964_v14, %v980_v33 }
 0x4ea   : > { %v1018_v37 = vpop.permute.xlu0 %1017 }
 0x4eb   : > { %1937 = vpow2.f32 %v989_v34  ;;  %v991_v32 = vmul.f32 1.442695, %v984_v35  ;;  %v1024_v38 = vsel %vm1022_vm6, %v1018_v37, 0 }
 0x4ec   : > { %1751 = vmatpush3.bf16.msra.mxu1 %v1024_v38  ;;  %v1067_v40 = vpop.permute.xlu1 %1066 }
 0x4ed   : > { %1939 = vpow2.f32 %v991_v32  ;;  %v1072_v41 = vsel %vm1022_vm6, %v1067_v40, 0  ;;  %1762 = vmatprep.subr.bf16.mxu1 %v2222_v8 }
 0x4ee   : > { %1757 = vmatpush3.bf16.msra.mxu0 %v1072_v41 }
 0x4ef   : > { %1768 = vmatprep.subr.bf16.mxu0 %v2222_v8 }
 0x4f2   : > { %v1936_v42 = vpop.eup %1935 }
 0x4f3   : > { %v996_v43 = vsel %vm775_vm4, %v1936_v42, 0.0 }
 0x4f4   : > { %997 = vadd.xlane.f32.xlu1 %v996_v43 }
 0x4f8   : > { %v1938_v44 = vpop.eup %1937 }
 0x4f9   : > { %v999_v45 = vsel %vm775_vm4, %v1938_v44, 0.0 }
 0x4fa   : > { %v1940_v46 = vpop.eup %1939  ;;  %1000 = vadd.xlane.f32.xlu0 %v999_v45  ;;  %v1925_v45 = vld [vmem:[%s2718_s12 + $0x18] sm:$0xff]  }
 0x4fb   : > { %v1002_v47 = vsel %vm775_vm4, %v1940_v46, 0.0 }
 0x4fc   : > { %1003 = vadd.xlane.f32.xlu1 %v1002_v47 }
 0x50d   : > { %1114 = vrot.lane.b32.xlu1 %v2543_v36, %s2228_s2 }
 0x510   : > { %1162 = vrot.lane.b32.xlu0 %v2546_v39, %s2228_s2  ;;  %s2662_s2 = scalar_lea.hbm %s2722_s16, %s1685_s20 }
 0x51b   : > { %v995_v48 = vpop.xlane.xlu0 %994 }
 0x51c   : > { %1941 = vrcp.f32 %v995_v48 }
 0x529   : > { %v1942_v49 = vpop.eup %1941 }
 0x52a   : > { %v1009_v50 = vmul.f32 %v1942_v49, %v1934_v25 }
 0x52c   : > { %v1013_v51 = vpack.c.bf16 %v1009_v50, %v1009_v50 }
 0x52e   : > { %1753 = vmatmul.mubr.msk.bf16.vlgmr.msra.gmra.mxu1 %vm775_vm4, %v1013_v51 }
 0x52f   : > { %1764 = vmatprep.mubr.msk.bf16.mxu1 %vm2223_vm1, %v2222_v8 }
 0x57d   : > { %v998_v52 = vpop.xlane.xlu1 %997 }
 0x57e   : > { %1943 = vrcp.f32 %v998_v52 }
 0x583   : > { %v1001_v53 = vpop.xlane.xlu0 %1000 }
 0x584   : > { %1945 = vrcp.f32 %v1001_v53 }
 0x585   : > { %v1004_v54 = vpop.xlane.xlu1 %1003 }
 0x586   : > { %1947 = vrcp.f32 %v1004_v54 }
 0x587   : > { %v1163_v57 = vpop.permute.xlu0 %1162 }
 0x588   : > { %v1168_v59 = vsel %vm1022_vm6, %v1163_v57, 0 }
 0x589   : > { %v1115_v36 = vpop.permute.xlu1 %1114 }
 0x58a   : > { %v1120_v55 = vsel %vm1022_vm6, %v1115_v36, 0  ;;  %v1672_v36 = vld [vmem:[#allocation11] ss:$0 sm:$0xff] }
 0x58b   : > { %v1944_v39 = vpop.eup %1943  ;;  %1763 = vmatpush3.bf16.msra.mxu1 %v1120_v55 }
 0x58c   : > { %v1010_v56 = vmul.f32 %v1944_v39, %v1936_v42  ;;  %1774 = vmatprep.subr.bf16.mxu1 %v2222_v8 }
 0x58e   : > { %v1014_v58 = vpack.c.bf16 %v1010_v56, %v1010_v56  ;;  %v1673_v56 = vld [vmem:[#allocation13] ss:$0 sm:$0xff] }
 0x590   : > { %1759 = vmatmul.mubr.msk.bf16.vlgmr.msra.gmra.mxu0 %vm775_vm4, %v1014_v58 }
 0x591   : > { %v1946_v60 = vpop.eup %1945  ;;  %1769 = vmatpush3.bf16.msra.mxu0 %v1168_v59  ;;  %1770 = vmatprep.mubr.msk.bf16.mxu0 %vm2223_vm1, %v2222_v8 }
 0x592   : > { %v1011_v61 = vmul.f32 %v1946_v60, %v1938_v44  ;;  %1782 = vmatprep.subr.bf16.mxu0 %v2222_v8  ;;  %v1923_v44 = vld [vmem:[%s2716_s10 + $0x8] sm:$0xff]  }
 0x593   : > { %v1948_v62 = vpop.eup %1947  ;;  %v1927_v60 = vld [vmem:[%s2718_s12 + $0x8] sm:$0xff]  }
 0x594   : > { %v1015_v63 = vpack.c.bf16 %v1011_v61, %v1011_v61  ;;  %v1012_v1 = vmul.f32 %v1948_v62, %v1940_v46  ;;  %v1926_v46 = vld [vmem:[%s2718_s12 + $0x10] sm:$0xff]   ;;  %v1928_v61 = vld [vmem:[%s2718_s12] sm:$0xff]  }
 0x595   : > { %v1674_v62 = vld [vmem:[%s2717_s11] ss:$0 sm:$0xff] }
 0x596   : > { %1765 = vmatmul.mubr.msk.bf16.vlgmr.msra.gmra.mxu1 %vm775_vm4, %v1015_v63  ;;  %v1016_v2 = vpack.c.bf16 %v1012_v1, %v1012_v1 }
 0x597   : > { %1778 = vmatprep.mubr.msk.bf16.mxu1 %vm2223_vm1, %v2222_v8  ;;  %1775 = vmatpush3.bf16.msra.mxu1 %v1921_v7 }
 0x598   : > { %1771 = vmatmul.mubr.msk.bf16.vlgmr.msra.gmra.mxu0 %vm775_vm4, %v1016_v2  ;;  %1776 = vmatprep.subr.bf16.mxu1 %v2222_v8 }
 0x599   : > { %1786 = vmatprep.mubr.msk.bf16.mxu0 %vm2223_vm1, %v2222_v8  ;;  %1783 = vmatpush3.bf16.msra.mxu0 %v1923_v44 }
 0x59a   : > { %1784 = vmatprep.subr.bf16.mxu0 %v2222_v8 }
 0x59b   : > { %1777 = vmatpush3.bf16.msra.mxu1 %v1922_v9 }
 0x59c   : > { %1790 = vmatprep.subr.bf16.mxu1 %v2222_v8 }
 0x5ee   : > { %v1060_v3 = vpop.f32.mrf.mxu1 }
 0x5f0   : > { %v1754_v4 = vpop.f32.mrf.mxu1 }
 0x5f2   : > { %v1063_v5 = vpop.f32.mrf.mxu1 }
 0x5f4   : > { %v1755_v6 = vpop.f32.mrf.mxu1 }
 0x650   : > { %v1108_v10 = vpop.f32.mrf.mxu0 }
 0x651   : > { %1211 = vrot.lane.b32.xlu1 %v1108_v10, %s2229_s27 }
 0x652   : > { %v1760_v11 = vpop.f32.mrf.mxu0 }
 0x654   : > { %v1111_v12 = vpop.f32.mrf.mxu0 }
 0x656   : > { %v1761_v13 = vpop.f32.mrf.mxu0  ;;  %v1156_v14 = vpop.f32.mrf.mxu1 }
 0x657   : > { %1215 = vrot.lane.b32.xlu0 %v1156_v14, %s2230_s24 }
 0x658   : > { %v1766_v15 = vpop.f32.mrf.mxu1  ;;  %v1204_v16 = vpop.f32.mrf.mxu0 }
 0x659   : > { %1219 = vrot.lane.b32.xlu1 %v1204_v16, %s2231_s28  ;;  %s1652_s28 = sshll.u32 %s2489_s8, 3 }
 0x65a   : > { %v1159_v17 = vpop.f32.mrf.mxu1  ;;  %v1772_v18 = vpop.f32.mrf.mxu0  ;;  %s621_s15 = scalar_lea.vmem [#allocation14], %s1652_s28 }
 0x65b   : > { %s1499_s18 = sshll.u32 %s621_s15, 4  ;;  %s2664_s18 = int_to_ptr.vmem [resolvable:$true] %s1499_s18 }
 0x65c   : > { %v1767_v19 = vpop.f32.mrf.mxu1  ;;  %v1207_v20 = vpop.f32.mrf.mxu0  ;;  %s2137_s5 = scalar_lea.vmem %s2664_s18, 128  ;;  %p2144_p11 = scmp.lt.s32.totalorder %s2664_s18, %s2142_s23 }
 0x65d   : > { %p2138_p2 = scmp.ne.s32.totalorder %s2664_s18, %s2137_s5  ;;  %p2145_p12 = scmp.lt.s32.totalorder %s2143_s26, %s2137_s5 }
 0x65e   : > { %v1773_v21 = vpop.f32.mrf.mxu0 }
 0x65f   : > { %p2139_p8 = pnand %p2138_p2, %p2761_p5  ;;  %p2146_p1 = por %p2145_p12, %p2144_p11 }
 0x661   : > { %p2140_p7 = pneg %p2139_p8 }
 0x663   : > { %p2147_p3 = pnand %p2146_p1, %p2140_p7 }
 0x6c3   : > { %v1212_v22 = vpop.permute.xlu1 %1211 }
 0x6c4   : > { %v1222_v23 = vsel %vm775_vm4, %v1060_v3, %v1212_v22 }
 0x6c9   : > { %v1216_v24 = vpop.permute.xlu0 %1215 }
 0x6ca   : > { %v1224_v25 = vsel %vm1223_vm7, %v1222_v23, %v1216_v24 }
 0x6cb   : > { %v1220_v26 = vpop.permute.xlu1 %1219 }
 0x6cc   : > { %v1226_v27 = vsel %vm1225_vm8, %v1224_v25, %v1220_v26 }
 0x6cd   : > { %v1227_v28 = vpack.c.bf16 %v1226_v27, %v1226_v27 }
 0x6cf   : > { %1779 = vmatmul.mubr.msk.bf16.vlgmr.msra.gmra.mxu1 %vm633_vm0, %v1227_v28 }
 0x6d0   : > { %1798 = vmatprep.mubr.msk.bf16.mxu1 %vm2223_vm1, %v2222_v8  ;;  %1791 = vmatpush3.bf16.msra.mxu1 %v1925_v45 }
 0x6d1   : > { %1792 = vmatprep.subr.bf16.mxu1 %v2222_v8 }
 0x6d4   : > { %1793 = vmatpush3.bf16.msra.mxu1 %v1926_v46 }
 0x6d5   : > { %1794 = vmatprep.subr.bf16.mxu1 %v2222_v8 }
 0x6d8   : > { %1795 = vmatpush3.bf16.msra.mxu1 %v1927_v60 }
 0x6d9   : > { %1796 = vmatprep.subr.bf16.mxu1 %v2222_v8  ;;  %v1678_v8 = vld [vmem:[%s2719_s13] ss:$0 sm:$0xff] }
 0x6dc   : > { %1797 = vmatpush3.bf16.msra.mxu1 %v1928_v61 }
 0x78f   : > { %v1288_v30 = vpop.f32.mrf.mxu1 }
 0x790   : > { %v1289_v31 = vadd.f32 %v1668_v29, %v1288_v30 }
 0x791   : > { %v1780_v33 = vpop.f32.mrf.mxu1 }
 0x792   : > { %v2621_v34 = vadd.f32 %v1289_v31, %v2514_v0  ;;  %v1924_v0 = vld [vmem:[%s2716_s10] sm:$0xff]  }
 0x793   : > { %v1291_v35 = vpop.f32.mrf.mxu1  ;;  %1785 = vmatpush3.bf16.msra.mxu0 %v1924_v0 }
 0x794   : > { %v1297_v37 = vsel %vm633_vm0, %v2621_v34, 0.0 }
 0x795   : > { %1298 = vadd.xlane.f32.xlu0 %v1297_v37  ;;  %v1781_v32 = vpop.f32.mrf.mxu1 }
 0x81e   : > { %v1299_v38 = vpop.xlane.xlu0 %1298 }
 0x81f   : > { %v1300_v40 = vmul.f32 0.03125, %v1299_v38 }
 0x821   : > { %v1301_v41 = vsub.f32 %v2621_v34, %v1300_v40 }
 0x823   : > { %v1302_v42 = vmul.f32 %v1301_v41, %v1301_v41  ;;  %v1320_v55 = vmul.f32 %v1672_v36, %v1301_v41 }
 0x825   : > { %v1303_v43 = vsel %vm633_vm0, %v1302_v42, 0.0 }
 0x826   : > { %1304 = vadd.xlane.f32.xlu1 %v1303_v43 }
 0x8af   : > { %v1305_v47 = vpop.xlane.xlu1 %1304 }
 0x8b0   : > { %v1306_v48 = vmul.f32 0.032258064, %v1305_v47 }
 0x8b2   : > { %1949 = vrsqrt.f32 %v1306_v48  ;;  %vm1309_vm9 = vcmp.eq.f32.partialorder %v1306_v48, inf  ;;  %v1312_v51 = vand.u32 2147483648, %v1306_v48  ;;  %vm1311_vm10 = vcmp.eq.f32.partialorder %v1306_v48, 0.0 }
 0x8bf   : > { %v1950_v49 = vpop.eup %1949 }
 0x8c0   : > { %v1308_v50 = vmul.f32 %v1950_v49, %v1306_v48 }
 0x8c2   : > { %v1310_v52 = vsel %vm1309_vm9, %v1306_v48, %v1308_v50 }
 0x8c3   : > { %v1313_v53 = vsel %vm1311_vm10, %v1312_v51, %v1310_v52 }
 0x8c4   : > { %v1321_v54 = vadd.f32 1e-06, %v1313_v53 }
 0x8c6   : > { %1951 = vrcp.f32 %v1321_v54 }
 0x8d3   : > { %v1952_v39 = vpop.eup %1951 }
 0x8d4   : > { %v1323_v57 = vmul.f32 %v1952_v39, %v1320_v55 }
 0x8d6   : > { %v1330_v58 = vadd.f32 %v1673_v56, %v1323_v57 }
 0x8d8   : > { %v1331_v59 = vpack.c.bf16 %v1330_v58, %v1330_v58 }
 0x8da   : > { %1787 = vmatmul.mubr.msk.bf16.vlgmr.msra.gmra.mxu0 %vm633_vm0, %v1331_v59 }
 0x99a   : > { %v1392_v63 = vpop.f32.mrf.mxu0 }
 0x99b   : > { %v1393_v1 = vadd.f32 %v1674_v62, %v1392_v63 }
 0x99c   : > { %v1788_v2 = vpop.f32.mrf.mxu0 }
 0x99d   : > { %v1398_v3 = vmax.f32 %v1393_v1, 0.0 }
 0x99e   : > { %v1395_v4 = vpop.f32.mrf.mxu0 }
 0x99f   : > { %v1399_v5 = vpack.c.bf16 %v1398_v3, %v1398_v3 }
 0x9a0   : > { %v1789_v6 = vpop.f32.mrf.mxu0 }
 0x9a1   : > { %1799 = vmatmul.mubr.msk.bf16.vlgmr.msra.gmra.mxu1 %vm1439_vm11, %v1399_v5 }
 0xa61   : > { %v1477_v7 = vpop.f32.mrf.mxu1 }
 0xa62   : > { %v1478_v9 = vadd.f32 %v1678_v8, %v1477_v7 }
 0xa63   : > { %v1800_v10 = vpop.f32.mrf.mxu1 }
 0xa64   : > { %v1483_v11 = vadd.f32 %v1478_v9, %v2621_v34 }
 0xa65   : > { %v1480_v12 = vpop.f32.mrf.mxu1 }
 0xa66   : > { %1484 = vst.msk [vmem:[%s621_s15] sm:$0xff] %vm633_vm0, %v1483_v11 }
 0xa67   : > { %v1801_v13 = vpop.f32.mrf.mxu1 }
 0xa68   : > { %2150 = shalt.err (!%p2147_p3)
}
 0xa69   : > { %s2151_s27 = scalar_lea.hbm %s2662_s2, 128  ;;  %s2155_s28 = scalar_lea.hbm %s2722_s16, 256 }
 0xa6a   : > { %p2152_p6 = scmp.ne.s32.totalorder %s2662_s2, %s2151_s27  ;;  %p2156_p10 = scmp.lt.s32.totalorder %s2662_s2, %s2722_s16 }
 0xa6b   : > { %p2157_p13 = scmp.lt.s32.totalorder %s2155_s28, %s2151_s27 }
 0xa6c   : > { %p2153_p4 = pnand %p2152_p6, %p2761_p5 }
 0xa6d   : > { %p2158_p0 = por %p2157_p13, %p2156_p10 }
 0xa6e   : > { %p2154_p9 = pneg %p2153_p4 }
 0xa70   : > { %p2159_p2 = pnand %p2158_p0, %p2154_p9 }
 0xa72   : > { %2162 = shalt.err (!%p2159_p2)
}
 0xa73   : > { %1828 = dma.vmem_to_hbm [thread:$0]  (%p2761_p5), %s2664_s18, 128, %s2662_s2, %s1486_s25  }
 0xa74 PF: > { %s1511_s20 = sand.u32 1, %s2201_s21   ;;  %p2762_p8 = scmp.ne.s32.totalorder %s2750_s30, 0 }
 0xa75   : > { %p2763_p7 = scmp.ge.s32.totalorder %s2213_s14, 2  ;;  %s1512_s15 = scalar_lea.sflag [#allocation4], %s1511_s20 }
 0xa77   : > { %p1854_p11 = pnand %p2763_p7, %p2762_p8 }
 0xa79   : > { %p1855_p12 = pneg %p1854_p11 }
 0xa7b   : > { %2196 = dma.done.wait (%p1855_p12), %s1512_s15, 128  }
 0xa7c   : > { %2198 = vsyncadd (%p1855_p12), %s1512_s15, 4294967168  ;;  %s2764_s29 = sld [smem:[#allocation20_spill]]  ;;  %p32_p1 = scmp.ge.s32.totalorder %s2426_s0, 4  }
 0xa7d   : > { %s2765_s23 = sld [smem:[#allocation21_spill]]  ;;  %s2766_s21 = smov %s2205_s22 }
 0xa7e   : > { %s2768_s14 = smov %s2426_s0  ;;  %34 = sbr.rel (!%p32_p1) target bundleno = 16 (0x10), region = 156 }
 0xa82   : > { %s2767_s22 = smov %s2764_s29 }
 0xa83   :  { %1517 = vsyncpa [#allocation3], 1 }
 0xa84   :  { %1519 = vsyncpa [#allocation3 + $0x1], 1 }
 0xa85   :  { %1520 = vsyncpa [#allocation6], 1 }
 0xa86   :  { %1521 = vsyncpa [#allocation9], 1 }
 0xa87   :  { %1522 = vsyncpa [#allocation12], 1 }
 0xa88   :  { %1523 = vsyncpa [#allocation4], 1 }
 0xa89   :  { %1525 = vsyncpa [#allocation4 + $0x1], 1 }

</bundles_post_ra>
